<compile_context>
chip_gen: v7x
topology: tpu7x:2x2x1
jax: 0.10.0
libtpu: 0.0.40
codegen_flags: <defaults>
</compile_context>

<pallas_src>
import math

import numpy as np

import jax
import jax.numpy as jnp
from jax.experimental import pallas as pl
from jax.experimental.pallas import tpu as pltpu


# ============================================================================
# 1) Relative positional encoding table (RelPositionalEncoding.forward(x_len))
# ============================================================================
def _rel_pe_kernel(ab_ref, out_ref):
    """out[r, c] = sin(r_global * A[c] + B[c]); all constants folded on the host.

    NOTE: jnp.sin lowers to a VPU range-reduction + polynomial on TPU (it is NOT
    a single EUP op), so this kernel is VALU-bound on v7x and roughly
    VALU/HBM-balanced on v6e.  One mul + one add + one sin per element.
    """
    tile_r = out_ref.shape[0]
    r0 = (pl.program_id(0) * tile_r).astype(jnp.float32)
    r = jax.lax.broadcasted_iota(jnp.int32, (tile_r, 1), 0).astype(jnp.float32) + r0
    a = ab_ref[0:1, :]          # (1, W)
    b = ab_ref[1:2, :]          # (1, W)
    out_ref[...] = jnp.sin(r * a + b).astype(out_ref.dtype)


def rel_positional_encoding(x_len: int, d_model: int, max_len: int = 5000, *,
                            max_block_bytes: int = 4 * 1024 * 1024,
                            out_dtype=jnp.float32) -> jax.Array:
    """Pallas equivalent of RelPositionalEncoding(d_model, max_len).forward(x_len).

    Returns (1, 2*x_len - 1, d_model):
        out[0, t, 2i]   = sin(s * div_term[i]),   s = x_len - 1 - t
        out[0, t, 2i+1] = cos(s * div_term[i])
    """
    assert d_model % 2 == 0, "d_model must be even (same constraint as the torch module)"
    assert 1 <= x_len <= max_len
    t_out = 2 * x_len - 1

    # Fold `fold` consecutive output rows into one kernel row so the kernel's
    # last dim (width) is a multiple of 128 -> unmasked, lane-dense stores.
    fold = 128 // math.gcd(d_model, 128)
    width = fold * d_model
    n_rows = -(-t_out // fold)

    # Host-side constants, computed in float64 and folded completely (per review):
    #   arg(r, c) = r * A[c] + B[c]
    #   A = -fold * inv_freq,   B = (x_len - 1 - row_off) * inv_freq + phase
    col = np.arange(width)
    j = col % d_model
    div_term = np.exp(np.arange(0, d_model, 2, dtype=np.float64)
                      * (-(math.log(10000.0) / d_model)))
    inv_freq = div_term[j // 2]                      # (width,)
    phase = (j % 2) * (np.pi / 2.0)                  # cos(x) = sin(x + pi/2)
    row_off = col // d_model                         # extra row index from folding
    a_host = -float(fold) * inv_freq
    b_host = (x_len - 1 - row_off) * inv_freq + phase
    ab = jnp.asarray(np.stack([a_host, b_host]), dtype=jnp.float32)   # (2, width)

    elem = jnp.dtype(out_dtype).itemsize
    # Single full-extent block unless the table is genuinely bigger than the cap:
    # splitting on single-TC v5e/v6e only adds ~0.35us/step of grid overhead.
    rows_cap = max(8, (max_block_bytes // (elem * width)) // 8 * 8)
    tile_r = n_rows if n_rows <= rows_cap else rows_cap
    grid_n = pl.cdiv(n_rows, tile_r)
    tile_bytes = tile_r * width * elem

    out_folded = pl.pallas_call(
        _rel_pe_kernel,
        out_shape=jax.ShapeDtypeStruct((n_rows, width), out_dtype),
        grid=(grid_n,),
        in_specs=[pl.BlockSpec((2, width), lambda i: (0, 0))],
        out_specs=pl.BlockSpec((tile_r, width), lambda i: (i, 0)),
        compiler_params=pltpu.CompilerParams(
            # On v7x, pltpu.CORE_PARALLEL here (with balanced even grid_n) would
            # shard row blocks across the two TensorCores; kept "arbitrary" for
            # portability since tables in this model are small.
            dimension_semantics=("arbitrary",),
            vmem_limit_bytes=int(min(96 * 1024 * 1024,
                                     max(4 * 1024 * 1024, 3 * tile_bytes))),
        ),
        cost_estimate=pl.CostEstimate(
            flops=2 * n_rows * width,
            transcendentals=n_rows * width,
            bytes_accessed=n_rows * width * elem + 2 * width * 4),
    )(ab)

    # Unfold: reshape is a free bitcast; the [:t_out] trim only copies when the
    # folded row count is padded (fold > 1) — negligible at these sizes.
    out = out_folded.reshape(n_rows * fold, d_model)[:t_out]
    return out[None, :, :]


# ============================================================================
# 2) RelPosEmbConformerBlock forward as a single VMEM-resident Pallas kernel
# ============================================================================
def _ln(x, w, b, eps=1e-5):
    m = jnp.mean(x, axis=-1, keepdims=True)
    c = x - m
    v = jnp.mean(c * c, axis=-1, keepdims=True)
    return c * jax.lax.rsqrt(v + eps) * w + b


def _sigm(x):
    return 1.0 / (1.0 + jnp.exp(-x))


def _conformer_block_kernel(
    x_ref, pe_t_ref,
    # ffn1
    f1_ln_w, f1_ln_b, f1_we, f1_be, f1_wp, f1_bp,
    # mhsa
    lnq_w, lnq_b, lnk_w, lnk_b, lnv_w, lnv_b,
    w_qs, w_ks, w_vs, w_pos_t, bias_u, bias_v, w_fc, shift_sel,
    # conv module
    c_ln_w, c_ln_b, c_w1a, c_w1b, c_wdw, c_bn_w, c_bn_b, c_w2,
    # ffn2
    f2_ln_w, f2_ln_b, f2_we, f2_be, f2_wp, f2_bp,
    # final layer norm
    lnf_w, lnf_b,
    out_ref,
):
    f32 = jnp.float32

    def dot(a, b):
        return jnp.dot(a, b, preferred_element_type=f32)

    x = x_ref[...]                      # (T, d)

    def ffn(h, ln_w, ln_b, we, be, wp, bp):
        z = _ln(h, ln_w[...], ln_b[...])
        z = dot(z, we[...]) + be[...]
        z = z * _sigm(z)                # Swish
        z = dot(z, wp[...]) + bp[...]
        return z + h                    # FFN-internal residual (dropout = identity)

    # ---- ffn1 (macaron half-residual) ----
    out = 0.5 * (x + ffn(x, f1_ln_w, f1_ln_b, f1_we, f1_be, f1_wp, f1_bp))

    # ---- rel-pos MHSA (modified FireRedASR variant: no head split, n_head==1) ----
    residual = out
    q = dot(_ln(out, lnq_w[...], lnq_b[...]), w_qs[...])     # x @ W (raw weight, no T)
    k = dot(_ln(out, lnk_w[...], lnk_b[...]), w_ks[...])
    v = dot(_ln(out, lnv_w[...], lnv_b[...]), w_vs[...])
    p_t = dot(w_pos_t[...], pe_t_ref[...])                   # (d, 2T-1) = (pe @ W_pos)^T
    q_u = q + bias_u[...]
    q_v = q + bias_v[...]
    ac = dot(q_u, k.T)                                       # (T, T)
    bd = dot(q_v, p_t)                                       # (T, 2T-1)
    # _rel_shift: bd_sh[i, j] = bd[i, j + T - 1 - i] via host-built one-hot selector.
    bd_sh = jnp.sum(bd[:, None, :] * shift_sel[...], axis=-1)   # (T, T)
    scores = ac + bd_sh                 # NOTE: module applies no 1/sqrt(d_k) scaling
    m = jnp.max(scores, axis=-1, keepdims=True)
    e = jnp.exp(scores - m)
    attn = e / jnp.sum(e, axis=-1, keepdims=True)
    ctx = dot(attn, v)                                       # (T, d)
    # forward_output: (.. @ fc.weight).sum(dim=0, keepdim=True) is identity for B==1.
    out = dot(ctx, w_fc[...]) + residual

    # ---- convolution module ----
    residual = out
    z = _ln(out, c_ln_w[...], c_ln_b[...])
    a_half = dot(z, c_w1a[...])          # pointwise_conv1, first  2d channels
    b_half = dot(z, c_w1b[...])          # pointwise_conv1, second 2d channels
    g = a_half * _sigm(b_half)           # GLU along channels          (T, 2d)
    # depthwise conv pre-matrixized on host: dconv[t,c] = sum_u g[u,c]*wdw[t,u,c]
    dconv = jnp.sum(g[None, :, :] * c_wdw[...], axis=1)      # (T, 2d)
    zb = _ln(dconv, c_bn_w[...], c_bn_b[...])
    zb = zb * _sigm(zb)                  # Swish
    out = dot(zb, c_w2[...]) + residual  # pointwise_conv2 + residual

    # ---- ffn2 + final LayerNorm ----
    out = 0.5 * (out + ffn(out, f2_ln_w, f2_ln_b, f2_we, f2_be, f2_wp, f2_bp))
    out = _ln(out, lnf_w[...], lnf_b[...])
    out_ref[...] = out.astype(out_ref.dtype)


def conformer_block_forward(x, pos_emb, x_len, params):
    """Pallas forward of RelPosEmbConformerBlock (batch == n_head == 1)."""
    B, T, d = x.shape
    assert B == 1 and params["n_head"] == 1 and x_len == T
    K = params["kernel_size"]
    pad = (K - 1) // 2
    d2 = 2 * d
    f32 = jnp.float32

    def row(v):
        return jnp.asarray(v, f32).reshape(1, -1)

    # ---- host-side weight prep (transposes / conv matrixization / selectors) ----
    # rel-shift one-hot selector: sel[i, j, k] = [k == j + T - 1 - i]
    ii = np.arange(T)[:, None, None]
    jj = np.arange(T)[None, :, None]
    kk = np.arange(2 * T - 1)[None, None, :]
    shift_sel = (kk == jj + (T - 1) - ii).astype(np.float32)            # (T, T, 2T-1)

    # depthwise conv as a (T, T, 2d) tensor: wmat[t, u, c] = w_dw[c, u - t + pad]
    dw = np.asarray(params["conv_dw_w"])[:, 0, :]                        # (2d, K)
    tt = np.arange(T)[:, None, None]
    uu = np.arange(T)[None, :, None]
    cc = np.arange(d2)[None, None, :]
    kidx = uu - tt + pad
    valid = (kidx >= 0) & (kidx < K)
    wmat = np.where(valid, dw[cc, np.clip(kidx, 0, K - 1)], 0.0).astype(np.float32)

    pw1 = jnp.asarray(params["conv_pw1_w"], f32)[:, :, 0]                # (4d, d)
    c_w1a = pw1[:d2].T                                                   # (d, 2d)
    c_w1b = pw1[d2:].T                                                   # (d, 2d)
    c_w2 = jnp.asarray(params["conv_pw2_w"], f32)[:, :, 0].T             # (2d, d)

    inputs = (
        jnp.asarray(x[0], f32),
        jnp.asarray(pos_emb[0], f32).T,                                  # (d, 2T-1)
        # ffn1
        row(params["ffn1_ln_w"]), row(params["ffn1_ln_b"]),
        jnp.asarray(params["ffn1_exp_w"], f32).T, row(params["ffn1_exp_b"]),
        jnp.asarray(params["ffn1_proj_w"], f32).T, row(params["ffn1_proj_b"]),
        # mhsa
        row(params["lnq_w"]), row(params["lnq_b"]),
        row(params["lnk_w"]), row(params["lnk_b"]),
        row(params["lnv_w"]), row(params["lnv_b"]),
        jnp.asarray(params["w_qs"], f32), jnp.asarray(params["w_ks"], f32),
        jnp.asarray(params["w_vs"], f32), jnp.asarray(params["w_pos"], f32).T,
        jnp.asarray(params["pos_bias_u"], f32), jnp.asarray(params["pos_bias_v"], f32),
        jnp.asarray(params["w_fc"], f32), jnp.asarray(shift_sel),
        # conv
        row(params["conv_ln_w"]), row(params["conv_ln_b"]),
        c_w1a, c_w1b, jnp.asarray(wmat),
        row(params["conv_bn_w"]), row(params["conv_bn_b"]), c_w2,
        # ffn2
        row(params["ffn2_ln_w"]), row(params["ffn2_ln_b"]),
        jnp.asarray(params["ffn2_exp_w"], f32).T, row(params["ffn2_exp_b"]),
        jnp.asarray(params["ffn2_proj_w"], f32).T, row(params["ffn2_proj_b"]),
        # final
        row(params["final_ln_w"]), row(params["final_ln_b"]),
    )

    out = pl.pallas_call(
        _conformer_block_kernel,
        out_shape=jax.ShapeDtypeStruct((T, d), jnp.float32),
    )(*inputs)
    return out[None]


# ============================================================================
# Parameter init (torch layout conventions) and pure-JAX references
# ============================================================================
def init_params(key, d_model, n_head, kernel_size):
    d = d_model
    d2, d4, K = 2 * d, 4 * d, kernel_size
    keys = iter(jax.random.split(key, 64))

    def nrm(shape, scale):
        return scale * jax.random.normal(next(keys), shape, dtype=jnp.float32)

    def ln_pair(n):
        return (1.0 + 0.1 * jax.random.normal(next(keys), (n,), jnp.float32),
                0.1 * jax.random.normal(next(keys), (n,), jnp.float32))

    p = {"n_head": n_head, "kernel_size": K}
    for pre in ("ffn1", "ffn2"):
        p[pre + "_ln_w"], p[pre + "_ln_b"] = ln_pair(d)
        p[pre + "_exp_w"] = nrm((d4, d), d ** -0.5)      # nn.Linear(d, 4d).weight
        p[pre + "_exp_b"] = nrm((d4,), 0.1)
        p[pre + "_proj_w"] = nrm((d, d4), d4 ** -0.5)    # nn.Linear(4d, d).weight
        p[pre + "_proj_b"] = nrm((d,), 0.1)
    for nm in ("lnq", "lnk", "lnv"):
        p[nm + "_w"], p[nm + "_b"] = ln_pair(d)
    for nm in ("w_qs", "w_ks", "w_vs", "w_pos", "w_fc"):
        p[nm] = nrm((d, d), d ** -0.5)
    p["pos_bias_u"] = nrm((n_head, d // n_head), d ** -0.5)
    p["pos_bias_v"] = nrm((n_head, d // n_head), d ** -0.5)
    p["conv_ln_w"], p["conv_ln_b"] = ln_pair(d)
    p["conv_pw1_w"] = nrm((d4, d, 1), d ** -0.5)         # Conv1d(d, 4d, 1).weight
    p["conv_dw_w"] = nrm((d2, 1, K), K ** -0.5)          # depthwise Conv1d weight
    p["conv_bn_w"], p["conv_bn_b"] = ln_pair(d2)
    p["conv_pw2_w"] = nrm((d, d2, 1), d2 ** -0.5)        # Conv1d(2d, d, 1).weight
    p["final_ln_w"], p["final_ln_b"] = ln_pair(d)
    return p


def _ref_ln(x, w, b, eps=1e-5):
    m = jnp.mean(x, axis=-1, keepdims=True)
    v = jnp.mean((x - m) ** 2, axis=-1, keepdims=True)
    return (x - m) / jnp.sqrt(v + eps) * w + b


def conformer_block_reference(x, pos_emb, x_len, p):
    """Literal (torch-structured) pure-JAX reference of the block forward."""
    HP = jax.lax.Precision.HIGHEST
    mm = lambda a, b: jnp.matmul(a, b, precision=HP)
    T = x_len
    d = x.shape[-1]
    n_head = p["n_head"]
    K = p["kernel_size"]
    pad = (K - 1) // 2
    d2 = 2 * d

    def ffn(h, pre):
        z = _ref_ln(h, p[pre + "_ln_w"], p[pre + "_ln_b"])
        z = mm(z, p[pre + "_exp_w"].T) + p[pre + "_exp_b"]
        z = z * jax.nn.sigmoid(z)
        z = mm(z, p[pre + "_proj_w"].T) + p[pre + "_proj_b"]
        return z + h

    def rel_shift(m_bd):
        zero = jnp.zeros((n_head, T, 1), jnp.float32)
        xp = jnp.concatenate([zero, m_bd], axis=-1)
        xp = xp.reshape(n_head, 2 * T, T)[:, 1:]
        return xp.reshape(n_head, T, 2 * T - 1)[:, :, :T]

    def mhsa(h):
        residual = h
        q = mm(_ref_ln(h, p["lnq_w"], p["lnq_b"]), p["w_qs"])
        k = jnp.swapaxes(mm(_ref_ln(h, p["lnk_w"], p["lnk_b"]), p["w_ks"]), 1, 2)
        v = mm(_ref_ln(h, p["lnv_w"], p["lnv_b"]), p["w_vs"])
        pp = jnp.swapaxes(mm(pos_emb, p["w_pos"]), 1, 2)
        q_u = q + p["pos_bias_u"]
        q_v = q + p["pos_bias_v"]
        scores = mm(q_u, k) + rel_shift(mm(q_v, pp))
        attn = jax.nn.softmax(scores, axis=-1)
        out = mm(attn, v)
        out = jnp.sum(mm(out, p["w_fc"]), axis=0, keepdims=True)
        return out + residual

    def conv(h):
        residual = h
        z = jnp.swapaxes(_ref_ln(h, p["conv_ln_w"], p["conv_ln_b"]), 1, 2)
        z = jax.lax.conv_general_dilated(z, p["conv_pw1_w"], (1,), "VALID",
                                         dimension_numbers=("NCH", "OIH", "NCH"),
                                         precision=HP)
        z = z[:, :d2] * jax.nn.sigmoid(z[:, d2:])                 # GLU(dim=1)
        z = jax.lax.conv_general_dilated(z, p["conv_dw_w"], (1,), [(pad, pad)],
                                         feature_group_count=d2,
                                         dimension_numbers=("NCH", "OIH", "NCH"),
                                         precision=HP)
        z = jnp.swapaxes(z, 1, 2)
        z = _ref_ln(z, p["conv_bn_w"], p["conv_bn_b"])
        z = z * jax.nn.sigmoid(z)
        z = jnp.swapaxes(z, 1, 2)
        z = jax.lax.conv_general_dilated(z, p["conv_pw2_w"], (1,), "VALID",
                                         dimension_numbers=("NCH", "OIH", "NCH"),
                                         precision=HP)
        return jnp.swapaxes(z, 1, 2) + residual

    out = 0.5 * (x + ffn(x, "ffn1"))
    out = mhsa(out)
    out = conv(out)
    out = 0.5 * (out + ffn(out, "ffn2"))
    return _ref_ln(out, p["final_ln_w"], p["final_ln_b"])


def _reference_pe_buffer(d_model, max_len):
    position = jnp.arange(max_len, dtype=jnp.float32)[:, None]
    div_term = jnp.exp(jnp.arange(0, d_model, 2, dtype=jnp.float32)
                       * (-(math.log(10000.0) / d_model)))
    pe_pos = jnp.zeros((max_len, d_model), jnp.float32)
    pe_pos = pe_pos.at[:, 0::2].set(jnp.sin(position * div_term))
    pe_pos = pe_pos.at[:, 1::2].set(jnp.cos(position * div_term))
    pe_neg = jnp.zeros((max_len, d_model), jnp.float32)
    pe_neg = pe_neg.at[:, 0::2].set(jnp.sin(-position * div_term))
    pe_neg = pe_neg.at[:, 1::2].set(jnp.cos(-position * div_term))
    pe_pos = jnp.flip(pe_pos, axis=0)[None]
    pe_neg = pe_neg[1:][None]
    return jnp.concatenate([pe_pos, pe_neg], axis=1)


def _reference_pe_forward(x_len, d_model, max_len):
    pe = _reference_pe_buffer(d_model, max_len)
    half = pe.shape[1] // 2
    return pe[:, half + 1 - x_len: half + x_len].astype(jnp.float32)


# ============================================================================
# main
# ============================================================================
if __name__ == "__main__":
    # The modified torch module only broadcasts correctly for batch == n_head == 1.
    d_model, n_head, T, K, max_len = 32, 1, 8, 33, 64
    key = jax.random.PRNGKey(0)
    kx, kp = jax.random.split(key)
    x = jax.random.normal(kx, (1, T, d_model), dtype=jnp.float32)
    x_len = T

    # --- positional-encoding kernel (feeds the block) + checks ---
    pos_emb = jax.block_until_ready(rel_positional_encoding(x_len, d_model, max_len))
    ref_pe = _reference_pe_forward(x_len, d_model, max_len)
    assert pos_emb.shape == (1, 2 * x_len - 1, d_model)
    assert pos_emb.dtype == jnp.float32
    assert jnp.allclose(pos_emb, ref_pe, atol=5e-5, rtol=5e-5)

    # second config: d_model multiple of 128 (no folding), odd row count
    pe2 = jax.block_until_ready(rel_positional_encoding(9, 128, 64))
    ref2 = _reference_pe_forward(9, 128, 64)
    assert pe2.shape == (1, 17, 128)
    assert jnp.allclose(pe2, ref2, atol=5e-5, rtol=5e-5)

    # --- full RelPosEmbConformerBlock forward as one Pallas kernel ---
    params = init_params(kp, d_model, n_head, K)
    out = jax.block_until_ready(conformer_block_forward(x, pos_emb, x_len, params))
    ref = conformer_block_reference(x, pos_emb, x_len, params)

    assert out.shape == (1, T, d_model)
    assert out.dtype == jnp.float32
    assert bool(jnp.all(jnp.isfinite(out)))
    err = float(jnp.max(jnp.abs(out - ref)))
    assert err < 2e-2, f"max abs err vs reference = {err}"

    print("KERNEL_OK")
</pallas_src>

<mosaic_0001>
module attributes {stable_mosaic.version = 11 : i64} {
  func.func @_rel_pe_kernel(%arg0: i32, %arg1: memref<2x128xf32, #tpu.memory_space<vmem>>, %arg2: memref<4x128xf32, #tpu.memory_space<vmem>>) attributes {dimension_semantics = [#tpu.dimension_semantics<arbitrary>], iteration_bounds = array<i64: 1>, scalar_prefetch = 0 : i64, scratch_operands = 0 : i64, tpu.core_type = #tpu.core_type<tc>, window_params = [{pipeline_mode = #tpu.pipeline_mode<synchronous>, transform_indices = @transform_0, window_bounds = array<i64: 2, 128>}, {transform_indices = @transform_1, window_bounds = array<i64: 4, 128>}]} {
    %c4_i32 = arith.constant 4 : i32
    %0 = arith.muli %arg0, %c4_i32 : i32
    %1 = arith.sitofp %0 : i32 to f32
    %2 = tpu.iota {dimensions = array<i32: 0>} : vector<4x1xi32>
    %3 = arith.sitofp %2 : vector<4x1xi32> to vector<4x1xf32>
    %4 = vector.broadcast %1 : f32 to vector<4x1xf32>
    %5 = arith.addf %3, %4 : vector<4x1xf32>
    %c0 = arith.constant 0 : index
    %c0_0 = arith.constant 0 : index
    %6 = vector.load %arg1[%c0, %c0_0] : memref<2x128xf32, #tpu.memory_space<vmem>>, vector<1x128xf32>
    %c1 = arith.constant 1 : index
    %c0_1 = arith.constant 0 : index
    %7 = vector.load %arg1[%c1, %c0_1] : memref<2x128xf32, #tpu.memory_space<vmem>>, vector<1x128xf32>
    %8 = vector.broadcast %5 : vector<4x1xf32> to vector<4x128xf32>
    %9 = vector.broadcast %6 : vector<1x128xf32> to vector<4x128xf32>
    %10 = arith.mulf %8, %9 : vector<4x128xf32>
    %11 = vector.broadcast %7 : vector<1x128xf32> to vector<4x128xf32>
    %12 = arith.addf %10, %11 : vector<4x128xf32>
    %13 = math.sin %12 : vector<4x128xf32>
    %c0_2 = arith.constant 0 : index
    %c0_3 = arith.constant 0 : index
    %14 = vector.load %arg2[%c0_2, %c0_3] : memref<4x128xf32, #tpu.memory_space<vmem>>, vector<4x128xf32>
    tpu.vector_store %arg2[%c0_2, %c0_3], %13 {strides = array<i32>} : memref<4x128xf32, #tpu.memory_space<vmem>>, vector<4x128xf32>,
    return
  }
  func.func @transform_0(%arg0: i32) -> (i32, i32) {
    %c0_i32 = arith.constant 0 : i32
    %c0_i32_0 = arith.constant 0 : i32
    %c0_i32_1 = arith.constant 0 : i32
    return %c0_i32, %c0_i32_0 : i32, i32
  }
  func.func @transform_1(%arg0: i32) -> (i32, i32) {
    %c0_i32 = arith.constant 0 : i32
    %c0_i32_0 = arith.constant 0 : i32
    return %arg0, %c0_i32 : i32, i32
  }
}

</mosaic_0001>

<bundles_post_ra>
// kernel: tpu_custom_call.1
= control target key start
LH: loop header
LB: loop body
LE: loop exit
PB: predicated region body
PF: predicated region fallthrough
CT: control target
= control target key end

     0   :  { %6 = vsyncpa [#allocation3], 0  ;;  %s293_s0 = inlined_call_operand.hbm [shape: f32[2,128], index: 0, kind: input, shape index: {}]   ;;  %s294_s1 = inlined_call_operand.hbm [shape: f32[4,128], index: 1, kind: output, shape index: {}]  }
   0x1   :  { %7 = vsyncpa [#allocation4], 0  ;;  %s230_s6 = smov [#allocation2]   ;;  %s182_s10 = scalar_lea.hbm %s293_s0, 32 }
   0x2   :  { %s14_s7 = sshll.u32 %s230_s6, 4  ;;  %p183_p0 = scmp.ne.s32.totalorder %s293_s0, %s182_s10  ;;  %s15_s7 = int_to_ptr.vmem [resolvable:$true] %s14_s7 }
   0x3   :  { %p186_p1 = scmp.lt.u32.totalorder %s182_s10, %s293_s0 }
   0x5   :  { %p188_p2 = pnand %p186_p1, %p183_p0 }
   0x7   :  { %191 = shalt.err (!%p188_p2)
}
   0x8   :  { %s192_s15 = scalar_lea.vmem %s15_s7, 32  ;;  %p197_p4 = scmp.lt.s32.totalorder %s15_s7, %s15_s7 }
   0x9   :  { %p193_p3 = scmp.ne.s32.totalorder %s15_s7, %s192_s15  ;;  %p198_p5 = scmp.lt.s32.totalorder %s192_s15, %s192_s15 }
   0xb   :  { %p199_p6 = por %p198_p5, %p197_p4 }
   0xd   :  { %p200_p7 = pnand %p199_p6, %p193_p3 }
   0xf   :  { %203 = shalt.err (!%p200_p7)
}
  0x10   :  { %17 = dma.hbm_to_vmem [thread:$0]  %s293_s0, 32, %s15_s7, [#allocation3]  }
  0x11   :  { %226 = dma.done.wait [#allocation3], 32  }
  0x12   :  { %227 = vsyncadd [#allocation3], 4294967264  ;;  %v23_v0 = vlaneseq  ;;  %v160_v3 = vld [vmem:[#allocation2] ss:$0 sm:$0xff]  ;;  %v161_v4 = vld [vmem:[#allocation2 + $0x1] ss:$0 sm:$0xff] }
  0x13   :  { %v231_v18 = vmov 683565275   ;;  %v232_v20 = vmov 2475754826   ;;  %v233_v22 = vmov 2131351028  }
  0x14   :  { %v24_v1 = vshrl.u32 %v23_v0, 7  ;;  %v234_v24 = vmov 2102212464   ;;  %v235_v26 = vmov 920167782   ;;  %s237_s0 = smov [#allocation5]  }
  0x15   :  { %v236_v33 = vmov 1326507024   ;;  %s151_s18 = sshll.u32 %s237_s0, 4  ;;  %s152_s18 = int_to_ptr.vmem [resolvable:$true] %s151_s18 }
  0x16   :  { %v25_v2 = vcvt.s32.f32 %v24_v1  ;;  %s204_s19 = scalar_lea.vmem %s152_s18, 64  ;;  %p209_p9 = scmp.lt.s32.totalorder %s152_s18, %s152_s18 }
  0x17   :  { %p205_p8 = scmp.ne.s32.totalorder %s152_s18, %s204_s19  ;;  %p210_p10 = scmp.lt.s32.totalorder %s204_s19, %s204_s19 }
  0x18   :  { %v34_v5 = vmul.f32 %v160_v3, %v25_v2 }
  0x19   :  { %p211_p11 = por %p210_p10, %p209_p9 }
  0x1a   :  { %v260_v6 = vadd.f32 %v161_v4, %v34_v5 }
  0x1b   :  { %p212_p12 = pnand %p211_p11, %p205_p8 }
  0x1c   :  { %v43_v7 = vand.u32 2139095040, %v260_v6  ;;  %v40_v9 = vand.u32 2147483647, %v260_v6  ;;  %vm42_vm7 = vcmp.lt.s32.totalorder %v260_v6, 0  ;;  %vm132_vm12 = vweird.f32 %v260_v6 }
  0x1e   :  { %v44_v8 = vshrl.u32 %v43_v7, 23  ;;  %v47_v12 = vand.u32 8388607, %v40_v9  ;;  %vm41_vm8 = vcmp.le.f32.partialorder %v40_v9, 0.7853982 }
  0x20   :  { %v162_v10 = vadd.s32 4294967169, %v44_v8  ;;  %v48_v15 = vor.u32 8388608, %v47_v12 }
  0x22   :  { %v50_v11 = vadd.s32 1, %v162_v10  ;;  %v88_v35 = vshll.u32 %v48_v15, 8 }
  0x24   :  { %vm51_vm0 = vcmp.gt.s32.totalorder %v50_v11, 0 }
  0x25   :  { %v52_v13 = vsel %vm51_vm0, %v50_v11, 0 }
  0x26   :  { %v54_v14 = vand.u32 31, %v52_v13  ;;  %v53_v16 = vshrl.u32 %v52_v13, 5 }
  0x28   :  { %v55_v17 = vsub.s32 32, %v54_v14  ;;  %v57_v19 = vshll.u32 %v231_v18, %v54_v14  ;;  %v60_v21 = vshll.u32 %v232_v20, %v54_v14  ;;  %v63_v23 = vshll.u32 %v233_v22, %v54_v14 }
  0x29   :  { %v66_v25 = vshll.u32 %v234_v24, %v54_v14  ;;  %v69_v27 = vshll.u32 %v235_v26, %v54_v14  ;;  %vm72_vm1 = vcmp.lt.s32.totalorder %v53_v16, 1  ;;  %vm75_vm2 = vcmp.lt.s32.totalorder %v53_v16, 4 }
  0x2a   :  { %v56_v28 = vshrl.u32 %v231_v18, %v55_v17  ;;  %v58_v29 = vshrl.u32 %v232_v20, %v55_v17  ;;  %v61_v30 = vshrl.u32 %v233_v22, %v55_v17  ;;  %v64_v31 = vshrl.u32 %v234_v24, %v55_v17 }
  0x2b   :  { %v67_v32 = vshrl.u32 %v235_v26, %v55_v17  ;;  %v70_v34 = vshrl.u32 %v236_v33, %v55_v17  ;;  %vm73_vm3 = vcmp.lt.s32.totalorder %v53_v16, 2  ;;  %vm74_vm4 = vcmp.lt.s32.totalorder %v53_v16, 3 }
  0x2c   :  { %v59_v36 = vor.u32 %v58_v29, %v57_v19  ;;  %v62_v37 = vor.u32 %v61_v30, %v60_v21  ;;  %v65_v38 = vor.u32 %v64_v31, %v63_v23 }
  0x2d   :  { %v68_v39 = vor.u32 %v67_v32, %v66_v25  ;;  %v71_v40 = vor.u32 %v70_v34, %v69_v27 }
  0x2e   :  { %v76_v41 = vsel %vm72_vm1, %v56_v28, %v59_v36  ;;  %v77_v42 = vsel %vm75_vm2, %v65_v38, 2102212464  ;;  %v80_v43 = vsel %vm72_vm1, %v59_v36, %v62_v37  ;;  %v84_v44 = vsel %vm72_vm1, %v62_v37, %v65_v38 }
  0x2f   :  { %v78_v45 = vsel %vm74_vm4, %v62_v37, %v77_v42  ;;  %v81_v46 = vsel %vm75_vm2, %v68_v39, 920167782  ;;  %v85_v47 = vsel %vm75_vm2, %v71_v40, 1326507024 }
  0x30   :  { %v82_v48 = vsel %vm74_vm4, %v65_v38, %v81_v46  ;;  %v86_v49 = vsel %vm74_vm4, %v68_v39, %v85_v47  ;;  %v79_v50 = vsel %vm73_vm3, %v76_v41, %v78_v45 }
  0x31   :  { %v83_v51 = vsel %vm73_vm3, %v80_v43, %v82_v48  ;;  %v87_v52 = vsel %vm73_vm3, %v84_v44, %v86_v49  ;;  %v95_v57 = vmul.u32 %v88_v35, %v79_v50 }
  0x32   :  { %v266_v53 = vmul.u32.u64.low %v88_v35, %v87_v52  ;;  %v267_v54 = vmul.u32.u64.high %v88_v35, %v87_v52, %v266_v53  ;;  %v269_v55 = vmul.u32.u64.low %v88_v35, %v83_v51  ;;  %v270_v56 = vmul.u32.u64.high %v88_v35, %v83_v51, %v269_v55 }
  0x34   :  { %vm97_vm5 = vc.u32 %v267_v54, %v269_v55  ;;  %v98_v58 = vadd.s32 1, %v270_v56  ;;  %v96_v5 = vadd.s32 %v269_v55, %v267_v54 }
  0x36   :  { %v99_v59 = vsel %vm97_vm5, %v98_v58, %v270_v56 }
  0x37   :  { %v100_v60 = vadd.s32 %v99_v59, %v95_v57 }
  0x39   :  { %v101_v61 = vadd.s32 536870912, %v100_v60 }
  0x3b   :  { %v102_v62 = vshrl.u32 %v101_v61, 30 }
  0x3d   :  { %v103_v63 = vshll.u32 %v102_v62, 30  ;;  %v126_v19 = vsub.s32 4, %v102_v62 }
  0x3f   :  { %v104_v0 = vsub.s32 %v100_v60, %v103_v63  ;;  %v127_v22 = vsel %vm42_vm7, %v126_v19, %v102_v62 }
  0x40   :  { %v129_v25 = vsel %vm41_vm8, 0, %v127_v22 }
  0x41   :  { %v106_v1 = vsub.s32 0, %v104_v0  ;;  %v133_v26 = vadd.s32 3, %v129_v25 }
  0x43   :  { %v163_v2 = vmin.u32 %v106_v1, %v104_v0  ;;  %v134_v27 = vand.u32 3, %v133_v26 }
  0x45   :  { %v108_v3 = vclz %v163_v2  ;;  %vm139_vm9 = vcmp.eq.s32.totalorder %v134_v27, 2  ;;  %vm136_vm10 = vcmp.eq.s32.totalorder %v134_v27, 0  ;;  %vm135_vm11 = vcmp.lt.s32.totalorder %v134_v27, 2 }
  0x47   :  { %v164_v4 = vadd.s32 4294967294, %v108_v3 }
  0x49   :  { %vm165_vm6 = vcmp.lt.s32.totalorder %v164_v4, 0 }
  0x4a   :  { %v111_v7 = vsel %vm165_vm6, 0, %v164_v4 }
  0x4b   :  { %v112_v8 = vsub.s32 32, %v111_v7  ;;  %v113_v10 = vshll.u32 %v104_v0, %v111_v7  ;;  %v116_v11 = vsub.s32 4294967266, %v111_v7 }
  0x4d   :  { %v114_v12 = vshrl.u32 %v96_v5, %v112_v8  ;;  %v117_v13 = vadd.s32 127, %v116_v11 }
  0x4f   :  { %v115_v14 = vor.u32 %v114_v12, %v113_v10  ;;  %v118_v15 = vshll.u32 %v117_v13, 23 }
  0x51   :  { %v119_v16 = vor.u32 4788187, %v118_v15  ;;  %v122_v17 = vcvt.s32.f32 %v115_v14 }
  0x53   :  { %v120_v18 = vand.u32 2147483647, %v119_v16 }
  0x55   :  { %v123_v20 = vmul.f32 %v122_v17, %v120_v18 }
  0x57   :  { %v124_v21 = vxor.u32 2147483648, %v123_v20 }
  0x59   :  { %v125_v23 = vsel %vm42_vm7, %v124_v21, %v123_v20 }
  0x5a   :  { %v128_v24 = vsel %vm41_vm8, %v260_v6, %v125_v23 }
  0x5b   :  { %178 = vcosq.f32 %v128_v24 }
  0x5c   :  { %180 = vsinq.f32 %v128_v24 }
  0x65   :  { %v179_v28 = vpop.eup %178 }
  0x66   :  { %v181_v29 = vpop.eup %180  ;;  %v140_v30 = vxor.u32 2147483648, %v179_v28 }
  0x67   :  { %v137_v31 = vxor.u32 2147483648, %v181_v29 }
  0x68   :  { %v141_v9 = vsel %vm139_vm9, %v140_v30, %v181_v29 }
  0x69   :  { %v138_v32 = vsel %vm136_vm10, %v179_v28, %v137_v31 }
  0x6a   :  { %v142_v33 = vsel %vm135_vm11, %v138_v32, %v141_v9 }
  0x6b   :  { %v143_v34 = vsel %vm132_vm12, nan, %v142_v33 }
  0x6c   :  { %144 = vst [vmem:[#allocation5] sm:$0xf] %v143_v34 }
  0x6d   :  { %215 = shalt.err (!%p212_p12)
}
  0x6e   :  { %s216_s22 = scalar_lea.hbm %s294_s1, 64 }
  0x6f   :  { %p217_p13 = scmp.ne.s32.totalorder %s294_s1, %s216_s22  ;;  %p220_p0 = scmp.lt.u32.totalorder %s216_s22, %s294_s1 }
  0x71   :  { %p222_p1 = pnand %p220_p0, %p217_p13 }
  0x73   :  { %225 = shalt.err (!%p222_p1)
}
  0x74   :  { %154 = dma.vmem_to_hbm [thread:$0]  %s152_s18, 64, %s294_s1, [#allocation4]  }
  0x75   :  { %228 = dma.done.wait [#allocation4], 64  }
  0x76   :  { %229 = vsyncadd [#allocation4], 4294967232 }
  0x77   :  { %158 = vsyncpa [#allocation3], 1 }
  0x78   :  { %159 = vsyncpa [#allocation4], 1 }

</bundles_post_ra>
